<compile_context>
chip_gen: v7x
topology: tpu7x:2x2x1
jax: 0.10.0
libtpu: 0.0.40
codegen_flags: <defaults>
</compile_context>

<pallas_src>
import functools

import jax
import jax.numpy as jnp
from jax.experimental import pallas as pl
from jax.experimental.pallas import tpu as pltpu


def _round_up(x, m):
    return ((x + m - 1) // m) * m


def _intermediate_kernel(x_ref, w_ref, b_ref, o_ref):
    # x_ref: (tm, H)  w_ref: (H, tn)  b_ref: (1, tn) f32  o_ref: (tm, tn)
    y = jnp.dot(x_ref[...], w_ref[...], preferred_element_type=jnp.float32)  # MXU
    y = y + b_ref[...]                                   # f32 bias broadcast (VALU)
    o_ref[...] = jnp.tanh(y).astype(o_ref.dtype)         # tanh on EUP, f32 epilogue


@functools.partial(jax.jit, static_argnames=("tm", "tn", "compute_dtype"))
def intermediate_layer(x, w, b, *, tm=512, tn=512, compute_dtype=None):
    """x: [B, S, H]; w: [H, I]; b: [I]. Returns tanh(x @ w + b): [B, S, I]."""
    B, S, H = x.shape
    I = w.shape[1]
    M = B * S
    out_dtype = x.dtype

    # ---- derive hardware-friendly tiles -------------------------------------
    # Row tile: multiple of 8 (sublane), as large as `tm` but never beyond the
    # padded row count. Rows are zero-padded to a multiple of the tile.
    tm_eff = min(tm, _round_up(M, 8))
    tm_eff = max(8, (tm_eff // 8) * 8)
    Mp = _round_up(M, tm_eff)

    # Output-feature tile: multiple of 128 (lane-dense -> unmasked vst) and a
    # divisor of the padded intermediate size.
    Ip = _round_up(I, 128)
    tn_eff = max(128, (min(tn, Ip) // 128) * 128)
    while Ip % tn_eff:
        tn_eff -= 128

    # ---- pad / cast operands ------------------------------------------------
    if compute_dtype is None:
        compute_dtype = x.dtype
    x2 = x.reshape(M, H)
    if Mp != M:
        x2 = jnp.pad(x2, ((0, Mp - M), (0, 0)))
    wp, bp = w, b
    if Ip != I:
        wp = jnp.pad(w, ((0, 0), (0, Ip - I)))
        bp = jnp.pad(b, ((0, Ip - I),))
    x2 = x2.astype(compute_dtype)
    wp = wp.astype(compute_dtype)
    b2 = bp.reshape(1, Ip).astype(jnp.float32)   # bias / tanh epilogue stays f32

    grid = (Mp // tm_eff, Ip // tn_eff)

    # ---- VMEM budget (double-buffered tiles) + scheduler cost hint ----------
    io_bytes = jnp.dtype(compute_dtype).itemsize
    out_bytes = jnp.dtype(out_dtype).itemsize
    vmem_est = (2 * (tm_eff * H + H * tn_eff) * io_bytes
                + 2 * tn_eff * 4
                + 2 * tm_eff * tn_eff * out_bytes)
    # Stay above the 32 MiB scoped default when needed, below v7x's 64 MiB VMEM.
    vmem_limit = int(min(max(vmem_est + (4 << 20), 32 << 20), 56 << 20))

    cost = pl.CostEstimate(
        flops=2 * Mp * H * Ip,
        transcendentals=Mp * Ip,
        bytes_accessed=(Mp * H + H * Ip) * io_bytes + Ip * 4 + Mp * Ip * out_bytes,
    )

    out = pl.pallas_call(
        _intermediate_kernel,
        out_shape=jax.ShapeDtypeStruct((Mp, Ip), out_dtype),
        grid_spec=pltpu.PrefetchScalarGridSpec(
            num_scalar_prefetch=0,
            grid=grid,
            in_specs=[
                pl.BlockSpec((tm_eff, H), lambda i, j: (i, 0)),   # activation tile
                pl.BlockSpec((H, tn_eff), lambda i, j: (0, j)),   # weight N-slab
                pl.BlockSpec((1, tn_eff), lambda i, j: (0, j)),   # bias slab
            ],
            out_specs=pl.BlockSpec((tm_eff, tn_eff), lambda i, j: (i, j)),
        ),
        compiler_params=pltpu.CompilerParams(
            dimension_semantics=("parallel", "parallel"),
            vmem_limit_bytes=vmem_limit,
        ),
        cost_estimate=cost,
    )(x2, wp, b2)

    return out[:M, :I].reshape(B, S, I)


if __name__ == "__main__":
    # Config (small, consistent with the module):
    batch = 2
    input_length = 8          # sequence length
    hidden_size = 32
    intermediate_size = 64

    key = jax.random.PRNGKey(0)
    kx, kw, kb = jax.random.split(key, 3)

    # Deterministic parameter init (PyTorch Linear-style uniform bounds).
    bound = 1.0 / (hidden_size ** 0.5)
    w = jax.random.uniform(kw, (hidden_size, intermediate_size),
                           dtype=jnp.float32, minval=-bound, maxval=bound)
    b = jax.random.uniform(kb, (intermediate_size,),
                           dtype=jnp.float32, minval=-bound, maxval=bound)
    x = jax.random.normal(kx, (batch, input_length, hidden_size), dtype=jnp.float32)

    ref = jnp.tanh(jnp.einsum("bsh,hi->bsi", x, w) + b)

    # f32 path (tight tolerance).
    out = jax.block_until_ready(intermediate_layer(x, w, b))
    assert out.shape == (batch, input_length, intermediate_size)
    assert jnp.allclose(out, ref, atol=1e-5, rtol=1e-5)

    # bf16 I/O with f32 accumulation (mem-bound win on v6e/v7x; looser tolerance).
    out_bf16 = jax.block_until_ready(
        intermediate_layer(x, w, b, compute_dtype=jnp.bfloat16))
    assert jnp.allclose(out_bf16, ref, atol=2e-2, rtol=2e-2)

    # Ragged shape exercising the row-padding and lane-padding paths.
    x_odd = jax.random.normal(kx, (2, 5, hidden_size), dtype=jnp.float32)
    out_odd = jax.block_until_ready(intermediate_layer(x_odd, w, b))
    ref_odd = jnp.tanh(jnp.einsum("bsh,hi->bsi", x_odd, w) + b)
    assert out_odd.shape == (2, 5, intermediate_size)
    assert jnp.allclose(out_odd, ref_odd, atol=1e-5, rtol=1e-5)

    print("KERNEL_OK")
</pallas_src>

<mosaic_0001>
module attributes {stable_mosaic.version = 11 : i64} {
  func.func @_intermediate_kernel(%arg0: i32, %arg1: i32, %arg2: memref<16x32xf32, #tpu.memory_space<vmem>>, %arg3: memref<32x128xf32, #tpu.memory_space<vmem>>, %arg4: memref<1x128xf32, #tpu.memory_space<vmem>>, %arg5: memref<16x128xf32, #tpu.memory_space<vmem>>) attributes {dimension_semantics = [#tpu.dimension_semantics<parallel>, #tpu.dimension_semantics<parallel>], iteration_bounds = array<i64: 1, 1>, scalar_prefetch = 0 : i64, scratch_operands = 0 : i64, tpu.core_type = #tpu.core_type<tc>, window_params = [{transform_indices = @transform_0, window_bounds = array<i64: 16, 32>}, {transform_indices = @transform_1, window_bounds = array<i64: 32, 128>}, {transform_indices = @transform_2, window_bounds = array<i64: 1, 128>}, {transform_indices = @transform_3, window_bounds = array<i64: 16, 128>}]} {
    %c0 = arith.constant 0 : index
    %c0_0 = arith.constant 0 : index
    %0 = vector.load %arg2[%c0, %c0_0] : memref<16x32xf32, #tpu.memory_space<vmem>>, vector<16x32xf32>
    %c0_1 = arith.constant 0 : index
    %c0_2 = arith.constant 0 : index
    %1 = vector.load %arg3[%c0_1, %c0_2] : memref<32x128xf32, #tpu.memory_space<vmem>>, vector<32x128xf32>
    %cst = arith.constant dense<0.000000e+00> : vector<16x128xf32>
    %2 = tpu.matmul %0, %1, %cst {dimension_numbers = #tpu.dot_dimension_numbers<[1], [0], [0], [1], [0, 0, 1, 1], [], []>} : vector<16x32xf32>, vector<32x128xf32>, vector<16x128xf32> -> vector<16x128xf32>
    %c0_3 = arith.constant 0 : index
    %c0_4 = arith.constant 0 : index
    %3 = vector.load %arg4[%c0_3, %c0_4] : memref<1x128xf32, #tpu.memory_space<vmem>>, vector<1x128xf32>
    %4 = vector.broadcast %3 : vector<1x128xf32> to vector<16x128xf32>
    %5 = arith.addf %2, %4 : vector<16x128xf32>
    %6 = math.tanh %5 : vector<16x128xf32>
    %c0_5 = arith.constant 0 : index
    %c0_6 = arith.constant 0 : index
    %7 = vector.load %arg5[%c0_5, %c0_6] : memref<16x128xf32, #tpu.memory_space<vmem>>, vector<16x128xf32>
    tpu.vector_store %arg5[%c0_5, %c0_6], %6 {strides = array<i32>} : memref<16x128xf32, #tpu.memory_space<vmem>>, vector<16x128xf32>,
    return
  }
  func.func @transform_0(%arg0: i32, %arg1: i32) -> (i32, i32) {
    %c0_i32 = arith.constant 0 : i32
    %c0_i32_0 = arith.constant 0 : i32
    return %arg0, %c0_i32 : i32, i32
  }
  func.func @transform_1(%arg0: i32, %arg1: i32) -> (i32, i32) {
    %c0_i32 = arith.constant 0 : i32
    %c0_i32_0 = arith.constant 0 : i32
    return %c0_i32, %arg1 : i32, i32
  }
  func.func @transform_2(%arg0: i32, %arg1: i32) -> (i32, i32) {
    %c0_i32 = arith.constant 0 : i32
    %c0_i32_0 = arith.constant 0 : i32
    return %c0_i32, %arg1 : i32, i32
  }
  func.func @transform_3(%arg0: i32, %arg1: i32) -> (i32, i32) {
    %c0_i32 = arith.constant 0 : i32
    return %arg0, %arg1 : i32, i32
  }
}

</mosaic_0001>

<bundles_post_ra>
// kernel: intermediate_layer.1
= control target key start
LH: loop header
LB: loop body
LE: loop exit
PB: predicated region body
PF: predicated region fallthrough
CT: control target
= control target key end

     0   :  { %vm27_vm0 = vcmask 261120   ;;  %s196_s1 = inlined_call_operand.vmem [shape: f32[32,128], index: 1, kind: input, shape index: {}]   ;;  %s197_s0 = inlined_call_operand.vmem [shape: f32[16,32], index: 0, kind: input, shape index: {}]   ;;  %s198_s2 = inlined_call_operand.vmem [shape: f32[1,128], index: 2, kind: input, shape index: {}]   ;;  %s199_s3 = inlined_call_operand.vmem [shape: f32[16,128], index: 3, kind: output, shape index: {}]  }
   0x1   :  { %v16_v0 = vld [vmem:[%s196_s1] sm:$0xff]  ;;  %v17_v1 = vld [vmem:[%s196_s1 + $0x8] sm:$0xff]  ;;  %v18_v2 = vld [vmem:[%s196_s1 + $0x10] sm:$0xff] }
   0x2   :  { %v137_v3 = vpack.c.bf16 %v17_v1, %v16_v0  ;;  %v19_v4 = vld [vmem:[%s196_s1 + $0x18] sm:$0xff]  ;;  %v14_v5 = vld [vmem:[%s197_s0] sm:$0xff]  ;;  %v15_v7 = vld [vmem:[%s197_s0 + $0x8] sm:$0xff] }
   0x3   :  { %v141_v6 = vpack.c.bf16 %v19_v4, %v18_v2  ;;  %134 = vmatprep.mubr.msk.f32.mxu0 %vm27_vm0, %v14_v5  ;;  %v117_v8 = vld [vmem:[%s198_s2] ss:$0 sm:$0xff] }
   0x4   :  { %138 = vmatprep.subr.bf16.mxu0 %v137_v3 }
   0x5   :  { %140 = vmatpush3.bf16.msra.mxu0 %v137_v3 }
   0x6   :  { %142 = vmatprep.subr.bf16.mxu0 %v141_v6 }
   0x9   :  { %144 = vmatpush3.bf16.msra.mxu0 %v141_v6 }
   0xc   :  { %135 = vmatmul.mubr.msk.f32.vlgmr.msra.gmra.mrb[0].mxu0 %vm27_vm0, %v15_v7 }
  0xdf   :  { %v136_v9 = vpop.f32.mrb[0].mxu0 }
  0xe0   :  { %v106_v10 = vadd.f32 %v136_v9, %v117_v8  ;;  %v100_v11 = vpop.f32.mrb[1].mxu0 }
  0xe1   :  { %v101_v12 = vadd.f32 %v117_v8, %v100_v11 }
  0xe2   :  { %145 = vtanh.f32 %v106_v10 }
  0xe3   :  { %147 = vtanh.f32 %v101_v12 }
  0xec   :  { %v146_v13 = vpop.eup %145 }
  0xed   :  { %v148_v14 = vpop.eup %147  ;;  %112 = vst [vmem:[%s199_s3 + $0x8] sm:$0xff] %v146_v13 }
  0xee   :  { %111 = vst [vmem:[%s199_s3] sm:$0xff] %v148_v14 }

</bundles_post_ra>
